<compile_context>
chip_gen: v7x
topology: tpu7x:2x2x1
jax: 0.10.0
libtpu: 0.0.40
codegen_flags: <defaults>
</compile_context>

<pallas_src>
import math

import jax
import jax.numpy as jnp
from jax.experimental import pallas as pl
from jax.experimental.pallas import tpu as pltpu


def _round_up(x, m):
    return (x + m - 1) // m * m


def _vmem_capacity_bytes():
    try:
        info = pltpu.get_tpu_info()
        cap = getattr(info, "vmem_capacity_bytes", None)
        if cap:
            return int(cap)
    except Exception:
        pass
    return 64 << 20  # conservative fallback: v7x per-TC VMEM


def _vmem_estimate(tm, d1, d2, hp, op, x_bytes, w_bytes, out_bytes):
    # Streamed activation/output tiles are double-buffered by the pipeline.
    streamed = 2 * tm * (d1 + d2) * x_bytes + 2 * tm * op * out_bytes
    # Resident parameters are single-buffered (pl.Buffered(1)); biases are f32.
    weights = ((d1 + d2) * hp + hp * op) * w_bytes + (hp + op) * 4
    # In-kernel temporaries: casted inputs, f32 h + its compute-dtype cast, f32 out.
    scratch = tm * ((d1 + d2) * w_bytes + hp * (4 + w_bytes) + op * 4)
    return streamed + weights + scratch


def merge_layer_kernel(x1_ref, x2_ref, w1a_ref, w1b_ref, b1_ref, w2_ref, b2_ref, o_ref):
    cd = w1a_ref.dtype
    # fc1 on the (implicitly) concatenated input: split the matmul over the two halves.
    h = jnp.dot(x1_ref[...].astype(cd), w1a_ref[...], preferred_element_type=jnp.float32)
    h = h + jnp.dot(x2_ref[...].astype(cd), w1b_ref[...], preferred_element_type=jnp.float32)
    h = h + b1_ref[...]          # (1, hp) broadcast add, f32
    h = jnp.maximum(h, 0.0)      # ReLU in f32 (no bf16 elementwise emulation on v5e)
    # Dropout(p=0.0) -> identity.
    out = jnp.dot(h.astype(w2_ref.dtype), w2_ref[...], preferred_element_type=jnp.float32)
    out = out + b2_ref[...]
    o_ref[...] = out.astype(o_ref.dtype)


def merge_layer(x1, x2, w1a, w1b, b1, w2, b2, *, tm=512, compute_dtype=None):
    """Fused MergeLayer forward.  Weights use (in, out) layout: y = x @ W + b."""
    M, dim1 = x1.shape
    M2, dim2 = x2.shape
    assert M == M2, "x1/x2 batch mismatch"
    hidden = w1a.shape[1]
    out_size = w2.shape[1]
    out_dtype = x1.dtype

    # Default to bf16 compute for f32 inputs (halves weight bytes, 2x MXU throughput);
    # activations are cast in-kernel so no extra HBM pass is introduced.
    if compute_dtype is None:
        compute_dtype = jnp.bfloat16 if x1.dtype == jnp.float32 else x1.dtype

    lane = 128
    hp = _round_up(hidden, lane)
    op = _round_up(out_size, lane)

    x_bytes = jnp.dtype(x1.dtype).itemsize
    w_bytes = jnp.dtype(compute_dtype).itemsize
    out_bytes = jnp.dtype(out_dtype).itemsize

    # --- generation-aware VMEM budget (leaves 25% headroom for compiler scratch) ---
    vmem_cap = _vmem_capacity_bytes()
    vmem_budget = vmem_cap * 3 // 4      # ~48 MiB on v7x, ~96 MiB on v5e/v6e

    # --- batch tile: as large as the budget allows; >= 2 grid steps when possible ---
    row_mult = 8 * max(1, 4 // w_bytes)              # 8 for f32 compute, 16 for bf16
    tm_eff = _round_up(max(tm, 8), row_mult)
    tm_eff = min(tm_eff, _round_up(M, 8))            # don't exceed the (8-rounded) batch
    if M >= 2 * row_mult:                            # keep both v7x TensorCores busy
        tm_eff = min(tm_eff, _round_up(pl.cdiv(M, 2), row_mult))
    tm_eff = max(8, _round_up(tm_eff, 8))
    while tm_eff > row_mult and _vmem_estimate(
            tm_eff, dim1, dim2, hp, op, x_bytes, w_bytes, out_bytes) > vmem_budget:
        tm_eff = max(row_mult, _round_up(tm_eff // 2, 8))

    grid = (pl.cdiv(M, tm_eff),)
    est = _vmem_estimate(tm_eff, dim1, dim2, hp, op, x_bytes, w_bytes, out_bytes)
    vmem_limit = int(min(vmem_budget, max(2 * est, 16 << 20)))

    # --- pad only the (tiny) parameters to lane-dense widths.  Padding is exact:
    #     padded hidden columns carry zero bias and zero W2 rows; padded output columns
    #     are sliced off after the call. ---
    w1a_p = jnp.zeros((dim1, hp), compute_dtype).at[:, :hidden].set(w1a.astype(compute_dtype))
    w1b_p = jnp.zeros((dim2, hp), compute_dtype).at[:, :hidden].set(w1b.astype(compute_dtype))
    w2_p = jnp.zeros((hp, op), compute_dtype).at[:hidden, :out_size].set(w2.astype(compute_dtype))
    b1_p = jnp.zeros((1, hp), jnp.float32).at[:, :hidden].set(
        b1.reshape(1, -1).astype(jnp.float32))
    b2_p = jnp.zeros((1, op), jnp.float32).at[:, :out_size].set(
        b2.reshape(1, -1).astype(jnp.float32))

    flops = 2 * M * (dim1 + dim2) * hidden + 2 * M * hidden * out_size
    bytes_accessed = (M * (dim1 + dim2) * x_bytes + M * op * out_bytes
                      + ((dim1 + dim2) * hp + hp * op) * w_bytes + (hp + op) * 4)

    def param_spec(shape):
        # Resident parameter block: constant index map, single-buffered.
        return pl.BlockSpec(shape, lambda i: (0, 0), pipeline_mode=pl.Buffered(1))

    out_p = pl.pallas_call(
        merge_layer_kernel,
        out_shape=jax.ShapeDtypeStruct((M, op), out_dtype),
        grid_spec=pltpu.PrefetchScalarGridSpec(
            num_scalar_prefetch=0,
            grid=grid,
            in_specs=[
                pl.BlockSpec((tm_eff, dim1), lambda i: (i, 0)),   # x1 tile (streamed, unpadded)
                pl.BlockSpec((tm_eff, dim2), lambda i: (i, 0)),   # x2 tile (streamed, unpadded)
                param_spec((dim1, hp)),                           # W1a (resident)
                param_spec((dim2, hp)),                           # W1b (resident)
                param_spec((1, hp)),                              # b1  (resident, f32)
                param_spec((hp, op)),                             # W2  (resident)
                param_spec((1, op)),                              # b2  (resident, f32)
            ],
            out_specs=pl.BlockSpec((tm_eff, op), lambda i: (i, 0)),
        ),
        compiler_params=pltpu.CompilerParams(
            dimension_semantics=("parallel",),   # shards batch steps across v7x's 2 TCs
            vmem_limit_bytes=vmem_limit,
        ),
        cost_estimate=pl.CostEstimate(flops=flops, transcendentals=0,
                                      bytes_accessed=bytes_accessed),
    )(x1, x2, w1a_p, w1b_p, b1_p, w2_p, b2_p)

    return out_p if op == out_size else out_p[:, :out_size]


def init_params(key, dim1, dim2, hidden, out_size, dtype=jnp.float32):
    # xavier_normal for weights (fan_in = dim1 + dim2 for fc1), stored (in, out).
    k1, k2, k3, k4 = jax.random.split(key, 4)
    fan_in1 = dim1 + dim2
    std1 = math.sqrt(2.0 / (fan_in1 + hidden))
    std2 = math.sqrt(2.0 / (hidden + out_size))
    w1 = std1 * jax.random.normal(k1, (fan_in1, hidden), dtype)
    w1a, w1b = w1[:dim1], w1[dim1:]
    w2 = std2 * jax.random.normal(k2, (hidden, out_size), dtype)
    b1 = 0.01 * jax.random.normal(k3, (1, hidden), dtype)
    b2 = 0.01 * jax.random.normal(k4, (1, out_size), dtype)
    return w1a, w1b, b1, w2, b2


def _reference(x1, x2, w1a, w1b, b1, w2, b2):
    x = jnp.concatenate([x1, x2], axis=-1)
    w1 = jnp.concatenate([w1a, w1b], axis=0)
    h = jnp.maximum(x @ w1 + b1, 0.0)
    return h @ w2 + b2


if __name__ == "__main__":
    key = jax.random.PRNGKey(0)
    kx1, kx2, kp, ky1, ky2 = jax.random.split(key, 5)

    # Small shapes consistent with the module.
    batch, dim1, dim2, hidden, out_size = 8, 16, 16, 32, 8
    x1 = jax.random.normal(kx1, (batch, dim1), jnp.float32)
    x2 = jax.random.normal(kx2, (batch, dim2), jnp.float32)
    w1a, w1b, b1, w2, b2 = init_params(kp, dim1, dim2, hidden, out_size)
    ref = _reference(x1, x2, w1a, w1b, b1, w2, b2)

    # Exact f32 compute path.
    out_f32 = merge_layer(x1, x2, w1a, w1b, b1, w2, b2, compute_dtype=jnp.float32)
    jax.block_until_ready(out_f32)
    assert out_f32.shape == (batch, out_size)
    assert jnp.allclose(out_f32, ref, atol=1e-5, rtol=1e-5)

    # Default path (bf16 compute, f32 accumulation): looser tolerance.
    out_def = merge_layer(x1, x2, w1a, w1b, b1, w2, b2)
    jax.block_until_ready(out_def)
    assert out_def.shape == (batch, out_size)
    assert jnp.allclose(out_def, ref, atol=5e-2, rtol=5e-2)

    # Ragged batch + multi-step grid (M not a multiple of tm): exercises the cdiv grid
    # and the masked writeback of the partial last tile.
    batch2 = 40
    y1 = jax.random.normal(ky1, (batch2, dim1), jnp.float32)
    y2 = jax.random.normal(ky2, (batch2, dim2), jnp.float32)
    ref2 = _reference(y1, y2, w1a, w1b, b1, w2, b2)
    out2 = merge_layer(y1, y2, w1a, w1b, b1, w2, b2, tm=16, compute_dtype=jnp.float32)
    jax.block_until_ready(out2)
    assert out2.shape == (batch2, out_size)
    assert jnp.allclose(out2, ref2, atol=1e-5, rtol=1e-5)

    print("KERNEL_OK")
</pallas_src>

<mosaic_0001>
module attributes {stable_mosaic.version = 11 : i64} {
  func.func @merge_layer_kernel(%arg0: i32, %arg1: memref<8x16xf32, #tpu.memory_space<vmem>>, %arg2: memref<8x16xf32, #tpu.memory_space<vmem>>, %arg3: memref<16x128xf32, #tpu.memory_space<vmem>>, %arg4: memref<16x128xf32, #tpu.memory_space<vmem>>, %arg5: memref<1x128xf32, #tpu.memory_space<vmem>>, %arg6: memref<128x128xf32, #tpu.memory_space<vmem>>, %arg7: memref<1x128xf32, #tpu.memory_space<vmem>>, %arg8: memref<8x128xf32, #tpu.memory_space<vmem>>) attributes {dimension_semantics = [#tpu.dimension_semantics<parallel>], iteration_bounds = array<i64: 1>, scalar_prefetch = 0 : i64, scratch_operands = 0 : i64, tpu.core_type = #tpu.core_type<tc>, window_params = [{transform_indices = @transform_0, window_bounds = array<i64: 8, 16>}, {transform_indices = @transform_1, window_bounds = array<i64: 8, 16>}, {pipeline_mode = #tpu.pipeline_mode<synchronous>, transform_indices = @transform_2, window_bounds = array<i64: 16, 128>}, {pipeline_mode = #tpu.pipeline_mode<synchronous>, transform_indices = @transform_3, window_bounds = array<i64: 16, 128>}, {pipeline_mode = #tpu.pipeline_mode<synchronous>, transform_indices = @transform_4, window_bounds = array<i64: 1, 128>}, {pipeline_mode = #tpu.pipeline_mode<synchronous>, transform_indices = @transform_5, window_bounds = array<i64: 128, 128>}, {pipeline_mode = #tpu.pipeline_mode<synchronous>, transform_indices = @transform_6, window_bounds = array<i64: 1, 128>}, {transform_indices = @transform_7, window_bounds = array<i64: 8, 128>}]} {
    %c0 = arith.constant 0 : index
    %c0_0 = arith.constant 0 : index
    %0 = vector.load %arg1[%c0, %c0_0] : memref<8x16xf32, #tpu.memory_space<vmem>>, vector<8x16xf32>
    %c0_1 = arith.constant 0 : index
    %c0_2 = arith.constant 0 : index
    %1 = vector.load %arg3[%c0_1, %c0_2] : memref<16x128xf32, #tpu.memory_space<vmem>>, vector<16x128xf32>
    %cst = arith.constant dense<0.000000e+00> : vector<8x128xf32>
    %2 = tpu.matmul %0, %1, %cst {dimension_numbers = #tpu.dot_dimension_numbers<[1], [0], [0], [1], [0, 0, 1, 1], [], []>} : vector<8x16xf32>, vector<16x128xf32>, vector<8x128xf32> -> vector<8x128xf32>
    %c0_3 = arith.constant 0 : index
    %c0_4 = arith.constant 0 : index
    %3 = vector.load %arg2[%c0_3, %c0_4] : memref<8x16xf32, #tpu.memory_space<vmem>>, vector<8x16xf32>
    %c0_5 = arith.constant 0 : index
    %c0_6 = arith.constant 0 : index
    %4 = vector.load %arg4[%c0_5, %c0_6] : memref<16x128xf32, #tpu.memory_space<vmem>>, vector<16x128xf32>
    %cst_7 = arith.constant dense<0.000000e+00> : vector<8x128xf32>
    %5 = tpu.matmul %3, %4, %cst_7 {dimension_numbers = #tpu.dot_dimension_numbers<[1], [0], [0], [1], [0, 0, 1, 1], [], []>} : vector<8x16xf32>, vector<16x128xf32>, vector<8x128xf32> -> vector<8x128xf32>
    %6 = arith.addf %2, %5 : vector<8x128xf32>
    %c0_8 = arith.constant 0 : index
    %c0_9 = arith.constant 0 : index
    %7 = vector.load %arg5[%c0_8, %c0_9] : memref<1x128xf32, #tpu.memory_space<vmem>>, vector<1x128xf32>
    %8 = vector.broadcast %7 : vector<1x128xf32> to vector<8x128xf32>
    %9 = arith.addf %6, %8 : vector<8x128xf32>
    %cst_10 = arith.constant 0.000000e+00 : f32
    %10 = vector.broadcast %cst_10 : f32 to vector<8x128xf32>
    %11 = arith.maximumf %9, %10 : vector<8x128xf32>
    %c0_11 = arith.constant 0 : index
    %c0_12 = arith.constant 0 : index
    %12 = vector.load %arg6[%c0_11, %c0_12] : memref<128x128xf32, #tpu.memory_space<vmem>>, vector<128x128xf32>
    %cst_13 = arith.constant dense<0.000000e+00> : vector<8x128xf32>
    %13 = tpu.matmul %11, %12, %cst_13 {dimension_numbers = #tpu.dot_dimension_numbers<[1], [0], [0], [1], [0, 0, 1, 1], [], []>} : vector<8x128xf32>, vector<128x128xf32>, vector<8x128xf32> -> vector<8x128xf32>
    %c0_14 = arith.constant 0 : index
    %c0_15 = arith.constant 0 : index
    %14 = vector.load %arg7[%c0_14, %c0_15] : memref<1x128xf32, #tpu.memory_space<vmem>>, vector<1x128xf32>
    %15 = vector.broadcast %14 : vector<1x128xf32> to vector<8x128xf32>
    %16 = arith.addf %13, %15 : vector<8x128xf32>
    %c0_16 = arith.constant 0 : index
    %c0_17 = arith.constant 0 : index
    %17 = vector.load %arg8[%c0_16, %c0_17] : memref<8x128xf32, #tpu.memory_space<vmem>>, vector<8x128xf32>
    tpu.vector_store %arg8[%c0_16, %c0_17], %16 {strides = array<i32>} : memref<8x128xf32, #tpu.memory_space<vmem>>, vector<8x128xf32>,
    return
  }
  func.func @transform_0(%arg0: i32) -> (i32, i32) {
    %c0_i32 = arith.constant 0 : i32
    %c0_i32_0 = arith.constant 0 : i32
    return %arg0, %c0_i32 : i32, i32
  }
  func.func @transform_1(%arg0: i32) -> (i32, i32) {
    %c0_i32 = arith.constant 0 : i32
    %c0_i32_0 = arith.constant 0 : i32
    return %arg0, %c0_i32 : i32, i32
  }
  func.func @transform_2(%arg0: i32) -> (i32, i32) {
    %c0_i32 = arith.constant 0 : i32
    %c0_i32_0 = arith.constant 0 : i32
    %c0_i32_1 = arith.constant 0 : i32
    return %c0_i32, %c0_i32_0 : i32, i32
  }
  func.func @transform_3(%arg0: i32) -> (i32, i32) {
    %c0_i32 = arith.constant 0 : i32
    %c0_i32_0 = arith.constant 0 : i32
    %c0_i32_1 = arith.constant 0 : i32
    return %c0_i32, %c0_i32_0 : i32, i32
  }
  func.func @transform_4(%arg0: i32) -> (i32, i32) {
    %c0_i32 = arith.constant 0 : i32
    %c0_i32_0 = arith.constant 0 : i32
    %c0_i32_1 = arith.constant 0 : i32
    return %c0_i32, %c0_i32_0 : i32, i32
  }
  func.func @transform_5(%arg0: i32) -> (i32, i32) {
    %c0_i32 = arith.constant 0 : i32
    %c0_i32_0 = arith.constant 0 : i32
    %c0_i32_1 = arith.constant 0 : i32
    return %c0_i32, %c0_i32_0 : i32, i32
  }
  func.func @transform_6(%arg0: i32) -> (i32, i32) {
    %c0_i32 = arith.constant 0 : i32
    %c0_i32_0 = arith.constant 0 : i32
    %c0_i32_1 = arith.constant 0 : i32
    return %c0_i32, %c0_i32_0 : i32, i32
  }
  func.func @transform_7(%arg0: i32) -> (i32, i32) {
    %c0_i32 = arith.constant 0 : i32
    %c0_i32_0 = arith.constant 0 : i32
    return %arg0, %c0_i32 : i32, i32
  }
}

</mosaic_0001>

<bundles_post_ra>
// kernel: tpu_custom_call.1
= control target key start
LH: loop header
LB: loop body
LE: loop exit
PB: predicated region body
PF: predicated region fallthrough
CT: control target
= control target key end

     0   :  { %12 = vsyncpa [#allocation3], 0  ;;  %s764_s0 = inlined_call_operand.hbm [shape: f32[8,16], index: 0, kind: input, shape index: {}]   ;;  %s765_s1 = inlined_call_operand.hbm [shape: f32[8,16], index: 1, kind: input, shape index: {}]   ;;  %s766_s2 = inlined_call_operand.hbm [shape: f32[16,128], index: 2, kind: input, shape index: {}]   ;;  %s767_s3 = inlined_call_operand.hbm [shape: f32[16,128], index: 3, kind: input, shape index: {}]   ;;  %s768_s4 = inlined_call_operand.vmem [shape: f32[1,128], index: 4, kind: input, shape index: {}]   ;;  %s769_s5 = inlined_call_operand.hbm [shape: f32[128,128], index: 5, kind: input, shape index: {}]   ;;  %s770_s6 = inlined_call_operand.vmem [shape: f32[1,128], index: 6, kind: input, shape index: {}]   ;;  %s771_s7 = inlined_call_operand.hbm [shape: f32[8,128], index: 7, kind: output, shape index: {}]  }
   0x1   :  { %13 = vsyncpa [#allocation6], 0 }
   0x2   :  { %14 = vsyncpa [#allocation9], 0 }
   0x3   :  { %15 = vsyncpa [#allocation4], 0  ;;  %s621_s24 = smov [#allocation5]   ;;  %s481_s28 = scalar_lea.hbm %s765_s1, 128 }
   0x4   :  { %s32_s25 = sshll.u32 %s621_s24, 4  ;;  %p482_p0 = scmp.ne.s32.totalorder %s765_s1, %s481_s28  ;;  %s33_s25 = int_to_ptr.vmem [resolvable:$true] %s32_s25 }
   0x5   :  { %p485_p1 = scmp.lt.u32.totalorder %s481_s28, %s765_s1 }
   0x7   :  { %p487_p2 = pnand %p485_p1, %p482_p0 }
   0x9   :  { %490 = shalt.err (!%p487_p2)
}
   0xa   :  { %s491_s10 = scalar_lea.vmem %s33_s25, 128  ;;  %p496_p4 = scmp.lt.s32.totalorder %s33_s25, %s33_s25 }
   0xb   :  { %p492_p3 = scmp.ne.s32.totalorder %s33_s25, %s491_s10  ;;  %p497_p5 = scmp.lt.s32.totalorder %s491_s10, %s491_s10 }
   0xd   :  { %p498_p6 = por %p497_p5, %p496_p4 }
   0xf   :  { %p499_p7 = pnand %p498_p6, %p492_p3 }
  0x11   :  { %502 = shalt.err (!%p499_p7)
}
  0x12   :  { %35 = dma.hbm_to_vmem [thread:$0]  %s765_s1, 128, %s33_s25, [#allocation6]  }
  0x13   :  { %s622_s13 = smov [#allocation8]   ;;  %s623_s15 = smov [#allocation2]  }
  0x14   :  { %s53_s14 = sshll.u32 %s622_s13, 4  ;;  %s22_s16 = sshll.u32 %s623_s15, 4  ;;  %s54_s14 = int_to_ptr.vmem [resolvable:$true] %s53_s14  ;;  %s23_s16 = int_to_ptr.vmem [resolvable:$true] %s22_s16 }
  0x15   :  { %s503_s19 = scalar_lea.hbm %s767_s3, 256 }
  0x16   :  { %p504_p8 = scmp.ne.s32.totalorder %s767_s3, %s503_s19  ;;  %p507_p9 = scmp.lt.u32.totalorder %s503_s19, %s767_s3 }
  0x18   :  { %p509_p10 = pnand %p507_p9, %p504_p8 }
  0x1a   :  { %512 = shalt.err (!%p509_p10)
}
  0x1b   :  { %s513_s1 = scalar_lea.vmem %s54_s14, 256  ;;  %p518_p12 = scmp.lt.s32.totalorder %s54_s14, %s54_s14 }
  0x1c   :  { %p514_p11 = scmp.ne.s32.totalorder %s54_s14, %s513_s1  ;;  %p519_p13 = scmp.lt.s32.totalorder %s513_s1, %s513_s1 }
  0x1e   :  { %p520_p0 = por %p519_p13, %p518_p12 }
  0x20   :  { %p521_p1 = pnand %p520_p0, %p514_p11 }
  0x22   :  { %524 = shalt.err (!%p521_p1)
}
  0x23   :  { %s624_s24 = smov 128   ;;  %s625_s25 = smov 8  }
  0x24   :  { %59 = dma.hbm_to_vmem [thread:$0]  %s767_s3, 256, %s54_s14, [#allocation9], %s624_s24, %s624_s24, %s625_s25  }
  0x25   :  { %s525_s30 = scalar_lea.hbm %s764_s0, 128 }
  0x26   :  { %p526_p2 = scmp.ne.s32.totalorder %s764_s0, %s525_s30  ;;  %p529_p3 = scmp.lt.u32.totalorder %s525_s30, %s764_s0 }
  0x28   :  { %p531_p4 = pnand %p529_p3, %p526_p2 }
  0x2a   :  { %534 = shalt.err (!%p531_p4)
}
  0x2b   :  { %s535_s12 = scalar_lea.vmem %s23_s16, 128  ;;  %p540_p6 = scmp.lt.s32.totalorder %s23_s16, %s23_s16 }
  0x2c   :  { %p536_p5 = scmp.ne.s32.totalorder %s23_s16, %s535_s12  ;;  %p541_p7 = scmp.lt.s32.totalorder %s535_s12, %s535_s12 }
  0x2e   :  { %p542_p8 = por %p541_p7, %p540_p6 }
  0x30   :  { %p543_p9 = pnand %p542_p8, %p536_p5 }
  0x32   :  { %546 = shalt.err (!%p543_p9)
}
  0x33   :  { %25 = dma.hbm_to_vmem [thread:$0]  %s764_s0, 128, %s23_s16, [#allocation3]  }
  0x34   :  { %s626_s14 = smov [#allocation7]   ;;  %s627_s17 = smov [#allocation10]  }
  0x35   :  { %s41_s15 = sshll.u32 %s626_s14, 4  ;;  %s67_s18 = sshll.u32 %s627_s17, 4  ;;  %s42_s15 = int_to_ptr.vmem [resolvable:$true] %s41_s15  ;;  %s68_s18 = int_to_ptr.vmem [resolvable:$true] %s67_s18 }
  0x36   :  { %s547_s21 = scalar_lea.hbm %s766_s2, 256 }
  0x37   :  { %p548_p10 = scmp.ne.s32.totalorder %s766_s2, %s547_s21  ;;  %p551_p11 = scmp.lt.u32.totalorder %s547_s21, %s766_s2 }
  0x39   :  { %p553_p12 = pnand %p551_p11, %p548_p10 }
  0x3b   :  { %556 = shalt.err (!%p553_p12)
}
  0x3c   :  { %s557_s0 = scalar_lea.vmem %s42_s15, 256  ;;  %p562_p0 = scmp.lt.s32.totalorder %s42_s15, %s42_s15 }
  0x3d   :  { %p558_p13 = scmp.ne.s32.totalorder %s42_s15, %s557_s0  ;;  %p563_p1 = scmp.lt.s32.totalorder %s557_s0, %s557_s0 }
  0x3f   :  { %p564_p2 = por %p563_p1, %p562_p0 }
  0x41   :  { %p565_p3 = pnand %p564_p2, %p558_p13 }
  0x43   :  { %568 = shalt.err (!%p565_p3)
}
  0x44   :  { %47 = dma.hbm_to_vmem [thread:$0]  %s766_s2, 256, %s42_s15, [#allocation6], %s624_s24, %s624_s24, %s625_s25  }
  0x45   :  { %s569_s30 = scalar_lea.hbm %s769_s5, 2048 }
  0x46   :  { %p570_p4 = scmp.ne.s32.totalorder %s769_s5, %s569_s30  ;;  %p573_p5 = scmp.lt.u32.totalorder %s569_s30, %s769_s5 }
  0x48   :  { %p575_p6 = pnand %p573_p5, %p570_p4 }
  0x4a   :  { %578 = shalt.err (!%p575_p6)
}
  0x4b   :  { %s579_s12 = scalar_lea.vmem %s68_s18, 2048  ;;  %p584_p8 = scmp.lt.s32.totalorder %s68_s18, %s68_s18 }
  0x4c   :  { %p580_p7 = scmp.ne.s32.totalorder %s68_s18, %s579_s12  ;;  %p585_p9 = scmp.lt.s32.totalorder %s579_s12, %s579_s12 }
  0x4e   :  { %p586_p10 = por %p585_p9, %p584_p8 }
  0x50   :  { %p587_p11 = pnand %p586_p10, %p580_p7 }
  0x52   :  { %590 = shalt.err (!%p587_p11)
}
  0x53   :  { %73 = dma.hbm_to_vmem [thread:$0]  %s769_s5, 2048, %s68_s18, [#allocation9], %s624_s24, %s624_s24, %s625_s25  }
  0x54   :  { %613 = dma.done.wait [#allocation3], 128  }
  0x55   :  { %614 = vsyncadd [#allocation3], 4294967168 }
  0x56   :  { %615 = dma.done.wait [#allocation6], 384  }
  0x57   :  { %616 = vsyncadd [#allocation6], 4294966912 }
  0x58   :  { %617 = dma.done.wait [#allocation9], 2304  }
  0x59   :  { %618 = vsyncadd [#allocation9], 4294964992  ;;  %v628_v0 = vmov 0.0|0.0   ;;  %vm629_vm0 = vmmov 0   ;;  %v630_v1 = vmov 0.0   ;;  %v95_v2 = vld [vmem:[#allocation8] sm:$0xff] }
  0x5a   :  { %440 = vmatprep.subr.bf16.mxu1 %v628_v0  ;;  %395 = vmatprep.mubr.msk.f32.mxu1 %vm629_vm0, %v630_v1  ;;  %v96_v3 = vld [vmem:[#allocation8 + $0x8] sm:$0xff]  ;;  %v92_v5 = vld [vmem:[#allocation7] sm:$0xff]  ;;  %v93_v6 = vld [vmem:[#allocation7 + $0x8] sm:$0xff]  ;;  %vm97_vm1 = vcmask 130048   ;;  %s631_s14 = smov [#allocation11]  }
  0x5b   :  { %446 = vmatprep.subr.bf16.mxu0 %v628_v0  ;;  %437 = vmatprep.mubr.msk.f32.mxu0 %vm629_vm0, %v630_v1  ;;  %v441_v4 = vpack.c.bf16 %v96_v3, %v95_v2  ;;  %v253_v7 = vld [vmem:[#allocation10] sm:$0xff]  ;;  %v254_v8 = vld [vmem:[#allocation10 + $0x8] sm:$0xff]  ;;  %v255_v9 = vld [vmem:[#allocation10 + $0x10] sm:$0xff]  ;;  %v444_v11 = vpack.c.bf16 %v93_v6, %v92_v5  ;;  %s353_s15 = sshll.u32 %s631_s14, 4  ;;  %s354_s15 = int_to_ptr.vmem [resolvable:$true] %s353_s15 }
  0x5c   :  { %v94_v10 = vld [vmem:[#allocation5] sm:$0xff]  ;;  %v447_v12 = vpack.c.bf16 %v254_v8, %v253_v7  ;;  %v257_v15 = vld [vmem:[#allocation10 + $0x20] sm:$0xff]  ;;  %v258_v16 = vld [vmem:[#allocation10 + $0x28] sm:$0xff]  ;;  %s591_s17 = scalar_lea.vmem %s354_s15, 128  ;;  %p596_p13 = scmp.lt.s32.totalorder %s354_s15, %s354_s15 }
  0x5d   :  { %442 = vmatpush3.bf16.msra.mxu1 %v441_v4  ;;  %v256_v13 = vld [vmem:[#allocation10 + $0x18] sm:$0xff]  ;;  %v91_v17 = vld [vmem:[#allocation2] sm:$0xff]  ;;  %v453_v18 = vpack.c.bf16 %v258_v16, %v257_v15  ;;  %v261_v22 = vld [vmem:[#allocation10 + $0x40] sm:$0xff]  ;;  %p592_p12 = scmp.ne.s32.totalorder %s354_s15, %s591_s17  ;;  %p597_p0 = scmp.lt.s32.totalorder %s591_s17, %s591_s17 }
  0x5e   :  { %443 = vmatprep.subr.bf16.mxu1 %v628_v0  ;;  %448 = vmatpush3.bf16.msra.mxu0 %v447_v12  ;;  %v450_v14 = vpack.c.bf16 %v256_v13, %v255_v9  ;;  %v259_v19 = vld [vmem:[#allocation10 + $0x30] sm:$0xff]  ;;  %v260_v20 = vld [vmem:[#allocation10 + $0x38] sm:$0xff]  ;;  %v262_v23 = vld [vmem:[#allocation10 + $0x48] sm:$0xff] }
  0x5f   :  { %449 = vmatprep.subr.bf16.mxu0 %v628_v0  ;;  %v456_v21 = vpack.c.bf16 %v260_v20, %v259_v19  ;;  %v459_v24 = vpack.c.bf16 %v262_v23, %v261_v22  ;;  %v263_v25 = vld [vmem:[#allocation10 + $0x50] sm:$0xff]  ;;  %v264_v26 = vld [vmem:[#allocation10 + $0x58] sm:$0xff]  ;;  %v265_v28 = vld [vmem:[#allocation10 + $0x60] sm:$0xff]  ;;  %p598_p1 = por %p597_p0, %p596_p13 }
  0x60   :  { %396 = vmatmul.mubr.msk.f32.vlgmr.msra.gmra.mrb[0].mxu1 %vm97_vm1, %v94_v10  ;;  %v462_v27 = vpack.c.bf16 %v264_v26, %v263_v25  ;;  %v266_v29 = vld [vmem:[#allocation10 + $0x68] sm:$0xff]  ;;  %v267_v31 = vld [vmem:[#allocation10 + $0x70] sm:$0xff]  ;;  %v268_v32 = vld [vmem:[#allocation10 + $0x78] sm:$0xff] }
  0x61   :  { %445 = vmatpush3.bf16.msra.mxu1 %v444_v11  ;;  %402 = vmatprep.mubr.msk.f32.mxu1 %vm629_vm0, %v630_v1  ;;  %v465_v30 = vpack.c.bf16 %v266_v29, %v265_v28  ;;  %v468_v33 = vpack.c.bf16 %v268_v32, %v267_v31  ;;  %v366_v37 = vld [vmem:[%s768_s4] ss:$0 sm:$0xff]  ;;  %p599_p2 = pnand %p598_p1, %p592_p12 }
  0x62   :  { %451 = vmatpush3.bf16.msra.mxu0 %v450_v14  ;;  %v367_v42 = vld [vmem:[%s770_s6] ss:$0 sm:$0xff] }
  0x63   :  { %452 = vmatprep.subr.bf16.mxu0 %v628_v0 }
  0x64   :  { %403 = vmatmul.mubr.msk.f32.vlgmr.msra.gmra.mrb[2].mxu1 %vm97_vm1, %v91_v17 }
  0x66   :  { %454 = vmatpush3.bf16.msra.mxu0 %v453_v18 }
  0x67   :  { %455 = vmatprep.subr.bf16.mxu0 %v628_v0 }
  0x6a   :  { %457 = vmatpush3.bf16.msra.mxu0 %v456_v21 }
  0x6b   :  { %458 = vmatprep.subr.bf16.mxu0 %v628_v0 }
  0x6e   :  { %460 = vmatpush3.bf16.msra.mxu0 %v459_v24 }
  0x6f   :  { %461 = vmatprep.subr.bf16.mxu0 %v628_v0 }
  0x72   :  { %463 = vmatpush3.bf16.msra.mxu0 %v462_v27 }
  0x73   :  { %464 = vmatprep.subr.bf16.mxu0 %v628_v0 }
  0x76   :  { %466 = vmatpush3.bf16.msra.mxu0 %v465_v30 }
  0x77   :  { %467 = vmatprep.subr.bf16.mxu0 %v628_v0 }
  0x7a   :  { %469 = vmatpush3.bf16.msra.mxu0 %v468_v33 }
 0x133   :  { %v167_v34 = vpop.f32.mrb[0].mxu1 }
 0x134   :  { %v397_v35 = vpop.f32.mrb[1].mxu1 }
 0x137   :  { %v240_v36 = vpop.f32.mrb[2].mxu1 }
 0x138   :  { %v241_v38 = vadd.f32 %v240_v36, %v167_v34  ;;  %v404_v39 = vpop.f32.mrb[3].mxu1 }
 0x13a   :  { %v251_v40 = vadd.f32 %v366_v37, %v241_v38 }
 0x13c   :  { %v252_v41 = vmax.f32 %v251_v40, 0.0 }
 0x13e   :  { %438 = vmatmul.mubr.f32.vlgmr.msra.gmra.mrb[0].mxu0 %v252_v41 }
 0x211   :  { %v342_v43 = vpop.f32.mrb[0].mxu0 }
 0x212   :  { %v343_v44 = vadd.f32 %v367_v42, %v342_v43  ;;  %v439_v45 = vpop.f32.mrb[1].mxu0 }
 0x214   :  { %346 = vst [vmem:[#allocation11] sm:$0xff] %v343_v44 }
 0x215   :  { %602 = shalt.err (!%p599_p2)
}
 0x216   :  { %s603_s19 = scalar_lea.hbm %s771_s7, 128 }
 0x217   :  { %p604_p3 = scmp.ne.s32.totalorder %s771_s7, %s603_s19  ;;  %p607_p4 = scmp.lt.u32.totalorder %s603_s19, %s771_s7 }
 0x219   :  { %p609_p5 = pnand %p607_p4, %p604_p3 }
 0x21b   :  { %612 = shalt.err (!%p609_p5)
}
 0x21c   :  { %356 = dma.vmem_to_hbm [thread:$0]  %s354_s15, 128, %s771_s7, [#allocation4]  }
 0x21d   :  { %619 = dma.done.wait [#allocation4], 128  }
 0x21e   :  { %620 = vsyncadd [#allocation4], 4294967168 }
 0x21f   :  { %360 = vsyncpa [#allocation3], 1 }
 0x220   :  { %361 = vsyncpa [#allocation6], 1 }
 0x221   :  { %362 = vsyncpa [#allocation9], 1 }
 0x222   :  { %363 = vsyncpa [#allocation4], 1 }

</bundles_post_ra>
